<compile_context>
chip_gen: v6e
topology: v6e:2x2x1
jax: 0.10.0
libtpu: 0.0.40
codegen_flags: <defaults>
</compile_context>

<pallas_src>
import functools

import jax
import jax.numpy as jnp
from jax.experimental import pallas as pl
from jax.experimental.pallas import tpu as pltpu


def _proj_kernel(x_ref, w_ref, b_ref, o_ref, *, p, th, wo, pc):
    """One M-tile of the patch projection (kh reduction fused in-kernel).

    x_ref : (th, p, Wo, pc) bf16  raw NHWC image rows for th output-row groups
    w_ref : (p, pc, C_out)  bf16  full weight, VMEM-resident across the grid
    b_ref : (1, C_out)      f32   bias, VMEM-resident
    o_ref : (th*Wo, C_out)  f32   output tile, written once
    """
    m = th * wo
    n = o_ref.shape[-1]
    # Bias folded into the accumulator init (no separate finalize pass).
    acc = jnp.broadcast_to(b_ref[...], (m, n))  # f32
    for kh in range(p):  # static unroll, p in {4, 8, 16}
        # (th, Wo, pc) -> (th*Wo, pc): free relayout when Wo%16==0 and pc%128==0.
        lhs = x_ref[:, kh, :, :].reshape(m, pc)          # bf16
        acc = acc + jnp.dot(lhs, w_ref[kh],
                            preferred_element_type=jnp.float32)
    o_ref[...] = acc.astype(o_ref.dtype)


def _vmem_config():
    """(vmem_limit_bytes, tile_budget_bytes) sized for the current chip."""
    cap = 64 * 1024 * 1024  # conservative fallback = v7x per-TensorCore VMEM
    try:
        info = pltpu.get_tpu_info()
        cap = int(getattr(info, "vmem_capacity_bytes", cap) or cap)
    except Exception:
        pass
    # ~48 MiB on v7x (64 MiB/TC), capped at 96 MiB on v5e/v6e (128 MiB).
    limit = min(cap * 3 // 4, 96 * 1024 * 1024)
    budget = limit * 5 // 6  # headroom for Mosaic internal scratch
    return limit, budget


def _pick_row_tile(rows, wo, pc, n, p, budget):
    """Pick th = image-row groups per tile.  Returns (th, needs_padding)."""
    # Per-output-row VMEM bytes:
    #   x block (bf16, 2x buffered)      : 4*p*pc
    #   out block (f32, 2x buffered)     : 8*n
    #   f32 accumulator temp (~2 copies) : 8*n
    #   lhs slice (bf16, worst-case copy): 2*pc
    per_row = 4 * p * pc + 16 * n + 2 * pc
    tm_cap = max(8, budget // per_row)
    th_cap = max(1, tm_cap // max(wo, 1))
    divs = [d for d in range(1, rows + 1)
            if rows % d == 0 and d <= th_cap and (d * wo) % 8 == 0]
    if divs:
        # Prefer >=2 grid steps so both v7x TensorCores get work.
        multi = [d for d in divs if rows // d >= 2]
        return (max(multi) if multi else max(divs)), False
    # Fallback: no divisor fits the budget -> pad rows to a budget-safe tile.
    th = min(th_cap, rows)
    th = max(8, (th // 8) * 8)  # keep tm = th*wo a multiple of 8 for any wo
    return th, True


def _proj_nhwc(x_nhwc, weight, bias, *, patch_size, out_dtype=jnp.float32):
    """Patch projection on channels-last data.

    x_nhwc: (B, H, W, C_in) any float dtype -> (B, H//p, W//p, C_out)
    weight: (C_out, C_in, p, p)  (PyTorch Conv2d layout)
    bias:   (C_out,)
    """
    B, H, W, C_in = x_nhwc.shape
    C_out = weight.shape[0]
    p = patch_size
    assert H % p == 0 and W % p == 0, (H, W, p)
    Ho, Wo = H // p, W // p
    rows = B * Ho
    pc = p * C_in
    M = rows * Wo

    x_bf = x_nhwc.astype(jnp.bfloat16)  # no-op if the wrapper already cast
    # Free (metadata-only) view: (B*Ho, kh, Wo, kw*C_in).  For a fixed kh the
    # minor axis is exactly the (kw, ci)-flattened patch columns, contiguous
    # in HBM, and the whole (th, p, Wo, pc) tile is one contiguous DMA.
    x_v = x_bf.reshape(rows, p, Wo, pc)

    # Conv weight (C_out, C_in, kh, kw) -> (kh, kw*C_in, C_out); bf16 for MXU.
    w_r = jnp.transpose(weight, (2, 3, 1, 0)).reshape(p, pc, C_out)
    w_r = w_r.astype(jnp.bfloat16)
    b_r = bias.reshape(1, C_out).astype(jnp.float32)

    vmem_limit, tile_budget = _vmem_config()
    th, needs_pad = _pick_row_tile(rows, Wo, pc, C_out, p, tile_budget)
    gi = -(-rows // th)          # ceil div
    rows_pad = gi * th
    if needs_pad or rows_pad != rows:
        x_v = jnp.pad(x_v, ((0, rows_pad - rows), (0, 0), (0, 0), (0, 0)))
    tm = th * Wo

    kernel = functools.partial(_proj_kernel, p=p, th=th, wo=Wo, pc=pc)

    out = pl.pallas_call(
        kernel,
        out_shape=jax.ShapeDtypeStruct((rows_pad * Wo, C_out), out_dtype),
        grid_spec=pltpu.PrefetchScalarGridSpec(
            num_scalar_prefetch=0,
            grid=(gi,),                                   # 1-D, all parallel
            in_specs=[
                pl.BlockSpec((th, p, Wo, pc), lambda i: (i, 0, 0, 0)),
                pl.BlockSpec((p, pc, C_out), lambda i: (0, 0, 0)),   # resident
                pl.BlockSpec((1, C_out), lambda i: (0, 0)),          # resident
            ],
            out_specs=pl.BlockSpec((tm, C_out), lambda i: (i, 0)),
        ),
        compiler_params=pltpu.CompilerParams(
            dimension_semantics=("parallel",),
            vmem_limit_bytes=vmem_limit,
        ),
    )(x_v, w_r, b_r)

    if rows_pad != rows:
        out = out[:M]
    return out.reshape(B, Ho, Wo, C_out)


@functools.partial(jax.jit, static_argnames=("patch_size",))
def patch_embed_nhwc(x_nhwc, weight, bias, *, patch_size=8):
    """NHWC-in / NHWC-out variant: no layout transposes around the kernel.
    Preferred when the surrounding pipeline is channels-last."""
    return _proj_nhwc(x_nhwc, weight, bias, patch_size=patch_size)


@functools.partial(jax.jit, static_argnames=("patch_size",))
def patch_embed(x, weight, bias, *, patch_size=8):
    """Equivalent of timm volo.PatchEmbed.forward with stem_conv=False.

    x:      (B, C_in, H, W) float32   (NCHW, as in the PyTorch module)
    weight: (C_out, C_in, p, p)       proj Conv2d weight
    bias:   (C_out,)
    returns (B, C_out, H//p, W//p) float32
    """
    # Single layout transpose with the bf16 cast fused into it (the transpose
    # writes half the bytes); the kernel itself reads NHWC directly.
    x_nhwc = jnp.transpose(x, (0, 2, 3, 1)).astype(jnp.bfloat16)
    out = _proj_nhwc(x_nhwc, weight, bias, patch_size=patch_size)
    return jnp.transpose(out, (0, 3, 1, 2))


if __name__ == "__main__":
    B = 2
    in_chans = 32        # plays the role of hidden_dim feeding the proj conv
    embed_dim = 128      # multiple of 128 -> lane-dense output stores
    patch_size = 4       # PatchEmbed requires patch_size in {4, 8, 16}
    H = W = 64           # -> Wo = 16 (bf16 sublane-aligned), pc = 128

    key = jax.random.PRNGKey(0)
    kx, kw, kb = jax.random.split(key, 3)
    x = jax.random.normal(kx, (B, in_chans, H, W), dtype=jnp.float32)
    weight = 0.05 * jax.random.normal(
        kw, (embed_dim, in_chans, patch_size, patch_size), dtype=jnp.float32)
    bias = 0.05 * jax.random.normal(kb, (embed_dim,), dtype=jnp.float32)

    out = patch_embed(x, weight, bias, patch_size=patch_size)
    out = jax.block_until_ready(out)

    # Reference: XLA conv with the same bf16 input rounding the kernel applies.
    x_bf = x.astype(jnp.bfloat16).astype(jnp.float32)
    w_bf = weight.astype(jnp.bfloat16).astype(jnp.float32)
    ref = jax.lax.conv_general_dilated(
        x_bf, w_bf,
        window_strides=(patch_size, patch_size),
        padding="VALID",
        dimension_numbers=("NCHW", "OIHW", "NCHW"),
        precision=jax.lax.Precision.HIGHEST,
    ) + bias[None, :, None, None]

    assert out.shape == (B, embed_dim, H // patch_size, W // patch_size), out.shape
    max_err = float(jnp.max(jnp.abs(out - ref)))
    assert jnp.allclose(out, ref, atol=2e-3, rtol=2e-3), max_err

    print("KERNEL_OK")
</pallas_src>

<mosaic_0001>
module attributes {stable_mosaic.version = 11 : i64} {
  func.func @_proj_kernel(%arg0: i32, %arg1: memref<16x4x16x128xbf16, #tpu.memory_space<vmem>>, %arg2: memref<4x128x128xbf16, #tpu.memory_space<vmem>>, %arg3: memref<1x128xf32, #tpu.memory_space<vmem>>, %arg4: memref<256x128xf32, #tpu.memory_space<vmem>>) attributes {dimension_semantics = [#tpu.dimension_semantics<parallel>], iteration_bounds = array<i64: 2>, scalar_prefetch = 0 : i64, scratch_operands = 0 : i64, tpu.core_type = #tpu.core_type<tc>, window_params = [{transform_indices = @transform_0, window_bounds = array<i64: 16, 4, 16, 128>}, {pipeline_mode = #tpu.pipeline_mode<synchronous>, transform_indices = @transform_1, window_bounds = array<i64: 4, 128, 128>}, {pipeline_mode = #tpu.pipeline_mode<synchronous>, transform_indices = @transform_2, window_bounds = array<i64: 1, 128>}, {transform_indices = @transform_3, window_bounds = array<i64: 256, 128>}]} {
    %c0 = arith.constant 0 : index
    %c0_0 = arith.constant 0 : index
    %0 = vector.load %arg3[%c0, %c0_0] : memref<1x128xf32, #tpu.memory_space<vmem>>, vector<1x128xf32>
    %1 = vector.shape_cast %0 : vector<1x128xf32> to vector<1x128xf32>
    %2 = vector.broadcast %1 : vector<1x128xf32> to vector<256x128xf32>
    %c0_1 = arith.constant 0 : index
    %c0_2 = arith.constant 0 : index
    %c0_3 = arith.constant 0 : index
    %c0_4 = arith.constant 0 : index
    %3 = vector.load %arg1[%c0_1, %c0_2, %c0_3, %c0_4] : memref<16x4x16x128xbf16, #tpu.memory_space<vmem>>, vector<16x1x16x128xbf16>
    %4 = vector.shape_cast %3 : vector<16x1x16x128xbf16> to vector<16x16x128xbf16>
    %5 = vector.shape_cast %4 : vector<16x16x128xbf16> to vector<256x128xbf16>
    %c0_5 = arith.constant 0 : index
    %c0_6 = arith.constant 0 : index
    %c0_7 = arith.constant 0 : index
    %6 = vector.load %arg2[%c0_5, %c0_6, %c0_7] : memref<4x128x128xbf16, #tpu.memory_space<vmem>>, vector<1x128x128xbf16>
    %7 = vector.shape_cast %6 : vector<1x128x128xbf16> to vector<128x128xbf16>
    %cst = arith.constant dense<0.000000e+00> : vector<256x128xf32>
    %8 = tpu.matmul %5, %7, %cst {dimension_numbers = #tpu.dot_dimension_numbers<[1], [0], [0], [1], [0, 0, 1, 1], [], []>} : vector<256x128xbf16>, vector<128x128xbf16>, vector<256x128xf32> -> vector<256x128xf32>
    %9 = arith.addf %2, %8 : vector<256x128xf32>
    %c0_8 = arith.constant 0 : index
    %c1 = arith.constant 1 : index
    %c0_9 = arith.constant 0 : index
    %c0_10 = arith.constant 0 : index
    %10 = vector.load %arg1[%c0_8, %c1, %c0_9, %c0_10] : memref<16x4x16x128xbf16, #tpu.memory_space<vmem>>, vector<16x1x16x128xbf16>
    %11 = vector.shape_cast %10 : vector<16x1x16x128xbf16> to vector<16x16x128xbf16>
    %12 = vector.shape_cast %11 : vector<16x16x128xbf16> to vector<256x128xbf16>
    %c1_11 = arith.constant 1 : index
    %c0_12 = arith.constant 0 : index
    %c0_13 = arith.constant 0 : index
    %13 = vector.load %arg2[%c1_11, %c0_12, %c0_13] : memref<4x128x128xbf16, #tpu.memory_space<vmem>>, vector<1x128x128xbf16>
    %14 = vector.shape_cast %13 : vector<1x128x128xbf16> to vector<128x128xbf16>
    %cst_14 = arith.constant dense<0.000000e+00> : vector<256x128xf32>
    %15 = tpu.matmul %12, %14, %cst_14 {dimension_numbers = #tpu.dot_dimension_numbers<[1], [0], [0], [1], [0, 0, 1, 1], [], []>} : vector<256x128xbf16>, vector<128x128xbf16>, vector<256x128xf32> -> vector<256x128xf32>
    %16 = arith.addf %9, %15 : vector<256x128xf32>
    %c0_15 = arith.constant 0 : index
    %c2 = arith.constant 2 : index
    %c0_16 = arith.constant 0 : index
    %c0_17 = arith.constant 0 : index
    %17 = vector.load %arg1[%c0_15, %c2, %c0_16, %c0_17] : memref<16x4x16x128xbf16, #tpu.memory_space<vmem>>, vector<16x1x16x128xbf16>
    %18 = vector.shape_cast %17 : vector<16x1x16x128xbf16> to vector<16x16x128xbf16>
    %19 = vector.shape_cast %18 : vector<16x16x128xbf16> to vector<256x128xbf16>
    %c2_18 = arith.constant 2 : index
    %c0_19 = arith.constant 0 : index
    %c0_20 = arith.constant 0 : index
    %20 = vector.load %arg2[%c2_18, %c0_19, %c0_20] : memref<4x128x128xbf16, #tpu.memory_space<vmem>>, vector<1x128x128xbf16>
    %21 = vector.shape_cast %20 : vector<1x128x128xbf16> to vector<128x128xbf16>
    %cst_21 = arith.constant dense<0.000000e+00> : vector<256x128xf32>
    %22 = tpu.matmul %19, %21, %cst_21 {dimension_numbers = #tpu.dot_dimension_numbers<[1], [0], [0], [1], [0, 0, 1, 1], [], []>} : vector<256x128xbf16>, vector<128x128xbf16>, vector<256x128xf32> -> vector<256x128xf32>
    %23 = arith.addf %16, %22 : vector<256x128xf32>
    %c0_22 = arith.constant 0 : index
    %c3 = arith.constant 3 : index
    %c0_23 = arith.constant 0 : index
    %c0_24 = arith.constant 0 : index
    %24 = vector.load %arg1[%c0_22, %c3, %c0_23, %c0_24] : memref<16x4x16x128xbf16, #tpu.memory_space<vmem>>, vector<16x1x16x128xbf16>
    %25 = vector.shape_cast %24 : vector<16x1x16x128xbf16> to vector<16x16x128xbf16>
    %26 = vector.shape_cast %25 : vector<16x16x128xbf16> to vector<256x128xbf16>
    %c3_25 = arith.constant 3 : index
    %c0_26 = arith.constant 0 : index
    %c0_27 = arith.constant 0 : index
    %27 = vector.load %arg2[%c3_25, %c0_26, %c0_27] : memref<4x128x128xbf16, #tpu.memory_space<vmem>>, vector<1x128x128xbf16>
    %28 = vector.shape_cast %27 : vector<1x128x128xbf16> to vector<128x128xbf16>
    %cst_28 = arith.constant dense<0.000000e+00> : vector<256x128xf32>
    %29 = tpu.matmul %26, %28, %cst_28 {dimension_numbers = #tpu.dot_dimension_numbers<[1], [0], [0], [1], [0, 0, 1, 1], [], []>} : vector<256x128xbf16>, vector<128x128xbf16>, vector<256x128xf32> -> vector<256x128xf32>
    %30 = arith.addf %23, %29 : vector<256x128xf32>
    %c0_29 = arith.constant 0 : index
    %c0_30 = arith.constant 0 : index
    %31 = vector.load %arg4[%c0_29, %c0_30] : memref<256x128xf32, #tpu.memory_space<vmem>>, vector<256x128xf32>
    tpu.vector_store %arg4[%c0_29, %c0_30], %30 {strides = array<i32>} : memref<256x128xf32, #tpu.memory_space<vmem>>, vector<256x128xf32>,
    return
  }
  func.func @transform_0(%arg0: i32) -> (i32, i32, i32, i32) {
    %c0_i32 = arith.constant 0 : i32
    %c0_i32_0 = arith.constant 0 : i32
    %c0_i32_1 = arith.constant 0 : i32
    %c0_i32_2 = arith.constant 0 : i32
    return %arg0, %c0_i32, %c0_i32_0, %c0_i32_1 : i32, i32, i32, i32
  }
  func.func @transform_1(%arg0: i32) -> (i32, i32, i32) {
    %c0_i32 = arith.constant 0 : i32
    %c0_i32_0 = arith.constant 0 : i32
    %c0_i32_1 = arith.constant 0 : i32
    %c0_i32_2 = arith.constant 0 : i32
    return %c0_i32, %c0_i32_0, %c0_i32_1 : i32, i32, i32
  }
  func.func @transform_2(%arg0: i32) -> (i32, i32) {
    %c0_i32 = arith.constant 0 : i32
    %c0_i32_0 = arith.constant 0 : i32
    %c0_i32_1 = arith.constant 0 : i32
    return %c0_i32, %c0_i32_0 : i32, i32
  }
  func.func @transform_3(%arg0: i32) -> (i32, i32) {
    %c0_i32 = arith.constant 0 : i32
    %c0_i32_0 = arith.constant 0 : i32
    return %arg0, %c0_i32 : i32, i32
  }
}

</mosaic_0001>

<bundles_post_ra>
// kernel: patch_embed.1
= control target key start
LH: loop header
LB: loop body
LE: loop exit
PB: predicated region body
PF: predicated region fallthrough
CT: control target
= control target key end

     0   :  { %8 = vsyncpa [#allocation3], 0  ;;  %s3128_s0 = inlined_call_operand.vmem [shape: bf16[32,4,16,128], index: 0, kind: input, shape index: {}]   ;;  %s3129_s1 = inlined_call_operand.vmem [shape: bf16[4,128,128], index: 1, kind: input, shape index: {}]   ;;  %s3130_s2 = inlined_call_operand.vmem [shape: f32[1,128], index: 2, kind: input, shape index: {}]   ;;  %s3131_s3 = inlined_call_operand.hbm [shape: f32[512,128], index: 3, kind: output, shape index: {}]  }
   0x1   :  { %10 = vsyncpa [#allocation3 + $0x1], 0  ;;  %s2603_s12 = smov 0   ;;  %s2605_s13 = smov 0  }
   0x2   :  { %s2607_s14 = smov 0   ;;  %s2609_s15 = smov 0  }
   0x3 LB: > { %s2624_s16 = sadd.s32 4294967295, %s2578_s15   ;;  %s1837_s17 = sadd.s32 4294967294, %s2578_s15   ;;  %s2578_s15 = sphi %s2609_s15, %s3163_s15   ;;  %s2574_s14 = sphi %s2607_s14, %s3162_s14   ;;  %s2570_s13 = sphi %s2605_s13, %s3161_s13   ;;  %s2566_s12 = sphi %s2603_s12, %s3160_s12  }
   0x4   : > { %s2628_s18 = sadd.s32 1, %s2578_s15   ;;  %s91_s19 = sadd.s32 1, %s2574_s14 }
   0x5   : > { %s88_s20 = ssub.s32 %s2578_s15, %s2628_s18  ;;  %p101_p0 = scmp.ne.s32.totalorder %s2574_s14, %s2570_s13 }
   0x6   : > { %p89_p1 = scmp.eq.s32.totalorder %s88_s20, 0  ;;  %p102_p2 = scmp.eq.s32.totalorder %s2624_s16, 1 }
   0x7   : > { %p107_p3 = scmp.ne.s32.totalorder %s2570_s13, %s2566_s12  ;;  %p108_p4 = scmp.eq.s32.totalorder %s1837_s17, 1 }
   0x8   : > { %s2639_s21 = scalar_select %p89_p1, %s2574_s14, %s91_s19  }
   0x9   : > { %p2641_p5 = por %p102_p2, %p101_p0  ;;  %p2645_p6 = por %p108_p4, %p107_p3 }
   0xa   : > { %p1840_p7 = scmp.ge.s32.totalorder %s2578_s15, 1  ;;  %p142_p8 = scmp.lt.s32.totalorder %s2578_s15, 3 }
   0xc   : > { %p143_p9 = pnand %p1840_p7, %p142_p8 }
   0xe   : > { %146 = sbr.rel (%p143_p9) target bundleno = 389 (0x185), region = 32 }
  0x13   : > { %v2422_v0 = vld [vmem:[%s3129_s1 + $0x38] sm:$0xff]   ;;  %s1842_s26 = sshll.u32 %s2624_s16, 4  ;;  %v2424_v2 = vld [vmem:[%s3129_s1 + $0x30] sm:$0xff]   ;;  %v2426_v4 = vld [vmem:[%s3129_s1 + $0x28] sm:$0xff]   ;;  %s164_s24 = sand.u32 1, %s2570_s13  }
  0x14   : > { %v2423_v1 = vld [vmem:[%s3129_s1 + $0x78] sm:$0xff]   ;;  %2189 = vmatprep.subr.bf16.mxu0 %v2422_v0  ;;  %p168_p10 = scmp.lt.s32.totalorder %s1842_s26, 31  ;;  %v2425_v3 = vld [vmem:[%s3129_s1 + $0x70] sm:$0xff]   ;;  %v2427_v5 = vld [vmem:[%s3129_s1 + $0x68] sm:$0xff]   ;;  %s1841_s25 = sshll.u32 %s164_s24, 8 }
  0x15   : > { %2237 = vmatprep.subr.bf16.mxu1 %v2423_v1  ;;  %2190 = vmatpush3.bf16.msra.mxu0 %v2422_v0  ;;  %v2428_v6 = vld [vmem:[%s3129_s1 + $0x20] sm:$0xff]   ;;  %v2430_v8 = vld [vmem:[%s3129_s1 + $0x18] sm:$0xff]   ;;  %v2432_v10 = vld [vmem:[%s3129_s1 + $0x10] sm:$0xff]   ;;  %s2963_s27 = scalar_lea.vmem [#allocation2], %s1841_s25  ;;  %s2092_s28 = sshll.u32 %s2624_s16, 12 }
  0x16   : > { %2238 = vmatpush3.bf16.msra.mxu1 %v2423_v1  ;;  %2191 = vmatprep.subr.bf16.mxu0 %v2424_v2  ;;  %s3165_s26 = smov (!%p168_p10, %s1842_s26), 31  ;;  %v2429_v7 = vld [vmem:[%s3129_s1 + $0x60] sm:$0xff]   ;;  %v2431_v9 = vld [vmem:[%s3129_s1 + $0x58] sm:$0xff]   ;;  %v2433_v11 = vld [vmem:[%s3129_s1 + $0x50] sm:$0xff]   ;;  %s1775_s29 = sshll.u32 %s2963_s27, 4  ;;  %s3082_s29 = int_to_ptr.vmem [resolvable:$true] %s1775_s29 }
  0x17   : > { %2239 = vmatprep.subr.bf16.mxu1 %v2425_v3  ;;  %s2091_s20 = sshll.u32 %s3165_s26, 5  ;;  %v2434_v14 = vld [vmem:[%s3129_s1 + $0x8] sm:$0xff]   ;;  %v2436_v16 = vld [vmem:[%s3129_s1] sm:$0xff]   ;;  %v2442_v19 = vld [vmem:[%s3129_s1 + $0xb8] sm:$0xff]   ;;  %s3080_s6 = scalar_lea.hbm %s3131_s3, %s2092_s28 }
  0x18   : > { %s2685_s4 = scalar_lea.vmem %s3128_s0, %s2091_s20  ;;  %v2435_v15 = vld [vmem:[%s3129_s1 + $0x48] sm:$0xff]   ;;  %v2437_v17 = vld [vmem:[%s3129_s1 + $0x40] sm:$0xff]   ;;  %v2443_v20 = vld [vmem:[%s3129_s1 + $0xf8] sm:$0xff]   ;;  %s3088_s16 = scalar_lea.sflag [#allocation3], %s164_s24 }
  0x19   : > { %2192 = vmatpush3.bf16.msra.mxu0 %v2424_v2  ;;  %v2438_v12 = vld [vmem:[%s2685_s4] sm:$0xff]   ;;  %v2439_v13 = vld [vmem:[%s2685_s4 + $0x8] sm:$0xff]   ;;  %v2448_v24 = vld [vmem:[%s3129_s1 + $0xb0] sm:$0xff]   ;;  %s2518_s26 = scalar_lea.vmem %s3082_s29, 4096  ;;  %s2580_s7 = smov [#allocation2]  }
  0x1a   : > { %2240 = vmatpush3.bf16.msra.mxu1 %v2425_v3  ;;  %2193 = vmatprep.subr.bf16.mxu0 %v2426_v4  ;;  %v2440_v18 = vld [vmem:[%s2685_s4 + $0x20] sm:$0xff]   ;;  %v2441_v21 = vld [vmem:[%s2685_s4 + $0x28] sm:$0xff]   ;;  %v2449_v25 = vld [vmem:[%s3129_s1 + $0xf0] sm:$0xff]   ;;  %p2519_p11 = scmp.ne.s32.totalorder %s3082_s29, %s2518_s26  ;;  %s2522_s8 = sshll.u32 %s2580_s7, 4  ;;  %s2523_s8 = int_to_ptr.vmem [resolvable:$false] %s2522_s8 }
  0x1b   : > { %2241 = vmatprep.subr.bf16.mxu1 %v2427_v5  ;;  %2205 = vmatprep.mubr.bf16.mxu0 %v2438_v12  ;;  %v2444_v22 = vld [vmem:[%s2685_s4 + $0x40] sm:$0xff]   ;;  %v2445_v23 = vld [vmem:[%s2685_s4 + $0x48] sm:$0xff]   ;;  %v2466_v36 = vld [vmem:[%s3129_s1 + $0x98] sm:$0xff]   ;;  %s2524_s9 = scalar_lea.vmem %s2523_s8, 8192  ;;  %p2525_p0 = scmp.lt.s32.totalorder %s3082_s29, %s2523_s8 }
  0x1c   : > { %2253 = vmatprep.mubr.bf16.mxu1 %v2439_v13  ;;  %v2446_v26 = vld [vmem:[%s2685_s4 + $0x60] sm:$0xff]   ;;  %v2454_v27 = vld [vmem:[%s3129_s1 + $0xa8] sm:$0xff]   ;;  %v2467_v37 = vld [vmem:[%s3129_s1 + $0xd8] sm:$0xff]   ;;  %p2520_p12 = pnand %p2519_p11, %p2641_p5  ;;  %p2526_p1 = scmp.lt.s32.totalorder %s2524_s9, %s2518_s26 }
  0x1d   : > { %2194 = vmatpush3.bf16.msra.mxu0 %v2426_v4  ;;  %v2455_v28 = vld [vmem:[%s3129_s1 + $0xe8] sm:$0xff]   ;;  %v2450_v30 = vld [vmem:[%s2685_s4 + $0x80] sm:$0xff]   ;;  %v2472_v40 = vld [vmem:[%s3129_s1 + $0x90] sm:$0xff]  }
  0x1e   : > { %2242 = vmatpush3.bf16.msra.mxu1 %v2427_v5  ;;  %2195 = vmatprep.subr.bf16.mxu0 %v2428_v6  ;;  %v2447_v29 = vld [vmem:[%s2685_s4 + $0x68] sm:$0xff]   ;;  %v2460_v32 = vld [vmem:[%s3129_s1 + $0xa0] sm:$0xff]   ;;  %v2473_v41 = vld [vmem:[%s3129_s1 + $0xd0] sm:$0xff]   ;;  %p2521_p13 = pneg %p2520_p12  ;;  %p2527_p2 = por %p2526_p1, %p2525_p0 }
  0x1f   : > { %2243 = vmatprep.subr.bf16.mxu1 %v2429_v7  ;;  %v2451_v31 = vld [vmem:[%s2685_s4 + $0x88] sm:$0xff]   ;;  %v2461_v33 = vld [vmem:[%s3129_s1 + $0xe0] sm:$0xff]   ;;  %v2486_v0 = vld [vmem:[%s2685_s4 + $0x10] sm:$0xff]  }
  0x20   : > { %v2452_v34 = vld [vmem:[%s2685_s4 + $0xa0] sm:$0xff]   ;;  %v2453_v35 = vld [vmem:[%s2685_s4 + $0xa8] sm:$0xff]   ;;  %v2487_v1 = vld [vmem:[%s2685_s4 + $0x18] sm:$0xff]   ;;  %p2528_p3 = pnand %p2527_p2, %p2521_p13 }
  0x21   : > { %2196 = vmatpush3.bf16.msra.mxu0 %v2428_v6  ;;  %v2456_v38 = vld [vmem:[%s2685_s4 + $0xc0] sm:$0xff]   ;;  %v2457_v39 = vld [vmem:[%s2685_s4 + $0xc8] sm:$0xff]   ;;  %v2488_v2 = vld [vmem:[%s2685_s4 + $0x30] sm:$0xff]  }
  0x22   : > { %2244 = vmatpush3.bf16.msra.mxu1 %v2429_v7  ;;  %2197 = vmatprep.subr.bf16.mxu0 %v2430_v8  ;;  %v2458_v42 = vld [vmem:[%s2685_s4 + $0xe0] sm:$0xff]   ;;  %v2459_v43 = vld [vmem:[%s2685_s4 + $0xe8] sm:$0xff]   ;;  %v2489_v3 = vld [vmem:[%s2685_s4 + $0x38] sm:$0xff]  }
  0x23   : > { %2245 = vmatprep.subr.bf16.mxu1 %v2431_v9  ;;  %v2462_v44 = vld [vmem:[%s2685_s4 + $0x100] sm:$0xff]   ;;  %v2463_v45 = vld [vmem:[%s2685_s4 + $0x108] sm:$0xff]   ;;  %v2490_v4 = vld [vmem:[%s2685_s4 + $0x50] sm:$0xff]  }
  0x24   : > { %v2478_v46 = vld [vmem:[%s3129_s1 + $0x88] sm:$0xff]   ;;  %v2464_v48 = vld [vmem:[%s2685_s4 + $0x120] sm:$0xff]   ;;  %v2491_v5 = vld [vmem:[%s2685_s4 + $0x58] sm:$0xff]  }
  0x25   : > { %2198 = vmatpush3.bf16.msra.mxu0 %v2430_v8  ;;  %v2479_v47 = vld [vmem:[%s3129_s1 + $0xc8] sm:$0xff]   ;;  %v2468_v50 = vld [vmem:[%s2685_s4 + $0x140] sm:$0xff]   ;;  %v2492_v6 = vld [vmem:[%s2685_s4 + $0x70] sm:$0xff]  }
  0x26   : > { %2246 = vmatpush3.bf16.msra.mxu1 %v2431_v9  ;;  %2199 = vmatprep.subr.bf16.mxu0 %v2432_v10  ;;  %v2465_v49 = vld [vmem:[%s2685_s4 + $0x128] sm:$0xff]   ;;  %v2484_v51 = vld [vmem:[%s3129_s1 + $0x80] sm:$0xff]   ;;  %v2493_v7 = vld [vmem:[%s2685_s4 + $0x78] sm:$0xff]  }
  0x27   : > { %2247 = vmatprep.subr.bf16.mxu1 %v2433_v11  ;;  %v2485_v52 = vld [vmem:[%s3129_s1 + $0xc0] sm:$0xff]   ;;  %v2469_v53 = vld [vmem:[%s2685_s4 + $0x148] sm:$0xff]   ;;  %v2494_v8 = vld [vmem:[%s2685_s4 + $0x90] sm:$0xff]  }
  0x28   : > { %v2470_v54 = vld [vmem:[%s2685_s4 + $0x160] sm:$0xff]   ;;  %v2471_v55 = vld [vmem:[%s2685_s4 + $0x168] sm:$0xff]   ;;  %v2495_v9 = vld [vmem:[%s2685_s4 + $0x98] sm:$0xff]  }
  0x29   : > { %2200 = vmatpush3.bf16.msra.mxu0 %v2432_v10  ;;  %v2474_v56 = vld [vmem:[%s2685_s4 + $0x180] sm:$0xff]   ;;  %v2475_v57 = vld [vmem:[%s2685_s4 + $0x188] sm:$0xff]   ;;  %v2496_v10 = vld [vmem:[%s2685_s4 + $0xb0] sm:$0xff]  }
  0x2a   : > { %2248 = vmatpush3.bf16.msra.mxu1 %v2433_v11  ;;  %2201 = vmatprep.subr.bf16.mxu0 %v2434_v14  ;;  %v2476_v58 = vld [vmem:[%s2685_s4 + $0x1a0] sm:$0xff]   ;;  %v2477_v59 = vld [vmem:[%s2685_s4 + $0x1a8] sm:$0xff]   ;;  %v2497_v11 = vld [vmem:[%s2685_s4 + $0xb8] sm:$0xff]  }
  0x2b   : > { %2249 = vmatprep.subr.bf16.mxu1 %v2435_v15  ;;  %v2480_v60 = vld [vmem:[%s2685_s4 + $0x1c0] sm:$0xff]   ;;  %v2481_v61 = vld [vmem:[%s2685_s4 + $0x1c8] sm:$0xff]   ;;  %v2498_v12 = vld [vmem:[%s2685_s4 + $0xd0] sm:$0xff]  }
  0x2c   : > { %v2482_v62 = vld [vmem:[%s2685_s4 + $0x1e0] sm:$0xff]   ;;  %v2483_v63 = vld [vmem:[%s2685_s4 + $0x1e8] sm:$0xff]   ;;  %v2499_v13 = vld [vmem:[%s2685_s4 + $0xd8] sm:$0xff]  }
  0x2d   : > { %2202 = vmatpush3.bf16.msra.mxu0 %v2434_v14  ;;  %v2500_v14 = vld [vmem:[%s2685_s4 + $0xf0] sm:$0xff]  }
  0x2e   : > { %2250 = vmatpush3.bf16.msra.mxu1 %v2435_v15  ;;  %2203 = vmatprep.subr.bf16.mxu0 %v2436_v16  ;;  %v2501_v15 = vld [vmem:[%s2685_s4 + $0xf8] sm:$0xff]  }
  0x2f   : > { %2251 = vmatprep.subr.bf16.mxu1 %v2437_v17 }
  0x31   : > { %2204 = vmatpush3.bf16.msra.mxu0 %v2436_v16  ;;  %v2502_v16 = vld [vmem:[%s2685_s4 + $0x110] sm:$0xff]  }
  0x32   : > { %2252 = vmatpush3.bf16.msra.mxu1 %v2437_v17  ;;  %2285 = vmatprep.subr.bf16.mxu0 %v2442_v19  ;;  %v2503_v17 = vld [vmem:[%s2685_s4 + $0x118] sm:$0xff]  }
  0x33   : > { %2333 = vmatprep.subr.bf16.mxu1 %v2443_v20 }
  0x34   : > { %2206 = vmatmul.mubr.bf16.vlgmr.msra.gmra.mxu0 %v2440_v18  ;;  %v2504_v18 = vld [vmem:[%s2685_s4 + $0x130] sm:$0xff]  }
  0x35   : > { %2254 = vmatmul.mubr.bf16.vlgmr.msra.gmra.mxu1 %v2441_v21  ;;  %2286 = vmatpush3.bf16.msra.mxu0 %v2442_v19  ;;  %v2505_v19 = vld [vmem:[%s2685_s4 + $0x138] sm:$0xff]  }
  0x36   : > { %2334 = vmatpush3.bf16.msra.mxu1 %v2443_v20  ;;  %2209 = vmatprep.mubr.bf16.mxu0 %v2444_v22  ;;  %v2506_v20 = vld [vmem:[%s2685_s4 + $0x150] sm:$0xff]   ;;  %v2507_v21 = vld [vmem:[%s2685_s4 + $0x158] sm:$0xff]  }
  0x37   : > { %2257 = vmatprep.mubr.bf16.mxu1 %v2445_v23  ;;  %2287 = vmatprep.subr.bf16.mxu0 %v2448_v24  ;;  %v2508_v22 = vld [vmem:[%s2685_s4 + $0x170] sm:$0xff]   ;;  %v2509_v23 = vld [vmem:[%s2685_s4 + $0x178] sm:$0xff]  }
  0x38   : > { %2335 = vmatprep.subr.bf16.mxu1 %v2449_v25 }
  0x39   : > { %2288 = vmatpush3.bf16.msra.mxu0 %v2448_v24  ;;  %v2510_v24 = vld [vmem:[%s2685_s4 + $0x190] sm:$0xff]  }
  0x3a   : > { %2336 = vmatpush3.bf16.msra.mxu1 %v2449_v25  ;;  %2289 = vmatprep.subr.bf16.mxu0 %v2454_v27  ;;  %v2511_v25 = vld [vmem:[%s2685_s4 + $0x198] sm:$0xff]  }
  0x3b   : > { %2337 = vmatprep.subr.bf16.mxu1 %v2455_v28 }
  0x3c   : > { %2210 = vmatmul.mubr.bf16.gmra.mxu0 %v2446_v26  ;;  %v2512_v26 = vld [vmem:[%s2685_s4 + $0x1b0] sm:$0xff]  }
  0x3d   : > { %2258 = vmatmul.mubr.bf16.gmra.mxu1 %v2447_v29  ;;  %2213 = vmatprep.mubr.bf16.mxu0 %v2450_v30  ;;  %v2515_v29 = vld [vmem:[%s2685_s4 + $0x1d8] sm:$0xff]   ;;  %v2516_v30 = vld [vmem:[%s2685_s4 + $0x1f0] sm:$0xff]  }
  0x3e   : > { %2261 = vmatprep.mubr.bf16.mxu1 %v2451_v31  ;;  %2290 = vmatpush3.bf16.msra.mxu0 %v2454_v27  ;;  %v2513_v27 = vld [vmem:[%s2685_s4 + $0x1b8] sm:$0xff]  }
  0x3f   : > { %2338 = vmatpush3.bf16.msra.mxu1 %v2455_v28  ;;  %2291 = vmatprep.subr.bf16.mxu0 %v2460_v32  ;;  %v2514_v28 = vld [vmem:[%s2685_s4 + $0x1d0] sm:$0xff]   ;;  %v2517_v31 = vld [vmem:[%s2685_s4 + $0x1f8] sm:$0xff]  }
  0x40   : > { %2339 = vmatprep.subr.bf16.mxu1 %v2461_v33 }
  0x42   : > { %2292 = vmatpush3.bf16.msra.mxu0 %v2460_v32 }
  0x43   : > { %2340 = vmatpush3.bf16.msra.mxu1 %v2461_v33  ;;  %2293 = vmatprep.subr.bf16.mxu0 %v2466_v36 }
  0x44   : > { %2214 = vmatmul.mubr.bf16.gmra.mxu0 %v2452_v34  ;;  %2341 = vmatprep.subr.bf16.mxu1 %v2467_v37 }
  0x45   : > { %2262 = vmatmul.mubr.bf16.gmra.mxu1 %v2453_v35  ;;  %2217 = vmatprep.mubr.bf16.mxu0 %v2456_v38 }
  0x46   : > { %2265 = vmatprep.mubr.bf16.mxu1 %v2457_v39  ;;  %2294 = vmatpush3.bf16.msra.mxu0 %v2466_v36 }
  0x47   : > { %2342 = vmatpush3.bf16.msra.mxu1 %v2467_v37  ;;  %2295 = vmatprep.subr.bf16.mxu0 %v2472_v40 }
  0x48   : > { %2343 = vmatprep.subr.bf16.mxu1 %v2473_v41 }
  0x4a   : > { %2296 = vmatpush3.bf16.msra.mxu0 %v2472_v40 }
  0x4b   : > { %2344 = vmatpush3.bf16.msra.mxu1 %v2473_v41  ;;  %2297 = vmatprep.subr.bf16.mxu0 %v2478_v46 }
  0x4c   : > { %2218 = vmatmul.mubr.bf16.gmra.mxu0 %v2458_v42  ;;  %2345 = vmatprep.subr.bf16.mxu1 %v2479_v47 }
  0x4d   : > { %2266 = vmatmul.mubr.bf16.gmra.mxu1 %v2459_v43  ;;  %2221 = vmatprep.mubr.bf16.mxu0 %v2462_v44 }
  0x4e   : > { %2269 = vmatprep.mubr.bf16.mxu1 %v2463_v45  ;;  %2298 = vmatpush3.bf16.msra.mxu0 %v2478_v46 }
  0x4f   : > { %2346 = vmatpush3.bf16.msra.mxu1 %v2479_v47  ;;  %2299 = vmatprep.subr.bf16.mxu0 %v2484_v51 }
  0x50   : > { %2347 = vmatprep.subr.bf16.mxu1 %v2485_v52 }
  0x52   : > { %2300 = vmatpush3.bf16.msra.mxu0 %v2484_v51 }
  0x53   : > { %2348 = vmatpush3.bf16.msra.mxu1 %v2485_v52 }
  0x54   : > { %2222 = vmatmul.mubr.bf16.gmra.mxu0 %v2464_v48 }
  0x55   : > { %2270 = vmatmul.mubr.bf16.gmra.mxu1 %v2465_v49  ;;  %2225 = vmatprep.mubr.bf16.mxu0 %v2468_v50 }
  0x56   : > { %2273 = vmatprep.mubr.bf16.mxu1 %v2469_v53 }
  0x5c   : > { %2226 = vmatmul.mubr.bf16.gmra.mxu0 %v2470_v54 }
  0x5d   : > { %2274 = vmatmul.mubr.bf16.gmra.mxu1 %v2471_v55  ;;  %2229 = vmatprep.mubr.bf16.mxu0 %v2474_v56 }
  0x5e   : > { %2277 = vmatprep.mubr.bf16.mxu1 %v2475_v57 }
  0x64   : > { %2230 = vmatmul.mubr.bf16.gmra.mxu0 %v2476_v58 }
  0x65   : > { %2278 = vmatmul.mubr.bf16.gmra.mxu1 %v2477_v59  ;;  %2233 = vmatprep.mubr.bf16.mxu0 %v2480_v60 }
  0x66   : > { %2281 = vmatprep.mubr.bf16.mxu1 %v2481_v61 }
  0x6c   : > { %2234 = vmatmul.mubr.bf16.gmra.mxu0 %v2482_v62 }
  0x6d   : > { %2282 = vmatmul.mubr.bf16.gmra.mxu1 %v2483_v63  ;;  %2301 = vmatprep.mubr.bf16.mxu0 %v2486_v0 }
  0x6e   : > { %2349 = vmatprep.mubr.bf16.mxu1 %v2487_v1 }
  0x74   : > { %2302 = vmatmul.mubr.bf16.vlgmr.msra.gmra.mxu0 %v2488_v2 }
  0x75   : > { %2350 = vmatmul.mubr.bf16.vlgmr.msra.gmra.mxu1 %v2489_v3  ;;  %2305 = vmatprep.mubr.bf16.mxu0 %v2490_v4 }
  0x76   : > { %2353 = vmatprep.mubr.bf16.mxu1 %v2491_v5 }
  0x7c   : > { %2306 = vmatmul.mubr.bf16.gmra.mxu0 %v2492_v6 }
  0x7d   : > { %2354 = vmatmul.mubr.bf16.gmra.mxu1 %v2493_v7  ;;  %2309 = vmatprep.mubr.bf16.mxu0 %v2494_v8 }
  0x7e   : > { %2357 = vmatprep.mubr.bf16.mxu1 %v2495_v9 }
  0x84   : > { %2310 = vmatmul.mubr.bf16.gmra.mxu0 %v2496_v10 }
  0x85   : > { %2358 = vmatmul.mubr.bf16.gmra.mxu1 %v2497_v11  ;;  %2313 = vmatprep.mubr.bf16.mxu0 %v2498_v12 }
  0x86   : > { %2361 = vmatprep.mubr.bf16.mxu1 %v2499_v13 }
  0x8c   : > { %2314 = vmatmul.mubr.bf16.gmra.mxu0 %v2500_v14 }
  0x8d   : > { %2362 = vmatmul.mubr.bf16.gmra.mxu1 %v2501_v15  ;;  %2317 = vmatprep.mubr.bf16.mxu0 %v2502_v16 }
  0x8e   : > { %2365 = vmatprep.mubr.bf16.mxu1 %v2503_v17 }
  0x94   : > { %2318 = vmatmul.mubr.bf16.gmra.mxu0 %v2504_v18 }
  0x95   : > { %2366 = vmatmul.mubr.bf16.gmra.mxu1 %v2505_v19  ;;  %2321 = vmatprep.mubr.bf16.mxu0 %v2506_v20 }
  0x96   : > { %2369 = vmatprep.mubr.bf16.mxu1 %v2507_v21 }
  0x9c   : > { %2322 = vmatmul.mubr.bf16.gmra.mxu0 %v2508_v22 }
  0x9d   : > { %2370 = vmatmul.mubr.bf16.gmra.mxu1 %v2509_v23  ;;  %2325 = vmatprep.mubr.bf16.mxu0 %v2510_v24  ;;  %v2928_v24 = vld [vmem:[%s3130_s2] ss:$0 sm:$0xff] }
  0x9e   : > { %2373 = vmatprep.mubr.bf16.mxu1 %v2511_v25 }
  0xa4   : > { %2326 = vmatmul.mubr.bf16.gmra.mxu0 %v2512_v26 }
  0xa5   : > { %2374 = vmatmul.mubr.bf16.gmra.mxu1 %v2513_v27  ;;  %2329 = vmatprep.mubr.bf16.mxu0 %v2514_v28 }
  0xa6   : > { %2377 = vmatprep.mubr.bf16.mxu1 %v2515_v29 }
  0xac   : > { %2330 = vmatmul.mubr.bf16.gmra.mxu0 %v2516_v30 }
  0xad   : > { %2378 = vmatmul.mubr.bf16.gmra.mxu1 %v2517_v31 }
  0xf4   : > { %v2207_v32 = vpop.f32.mrf.mxu0 }
  0xf5   : > { %v2817_v33 = vpop.f32.mrf.mxu1  ;;  %v538_v28 = vadd.f32 %v2207_v32, %v2928_v24 }
  0xf6   : > { %v409_v34 = vpop.f32.mrf.mxu0 }
  0xf7   : > { %v2819_v35 = vpop.f32.mrf.mxu1  ;;  %v536_v31 = vadd.f32 %v2928_v24, %v409_v34 }
  0xf8   : > { %v2821_v36 = vpop.f32.mrf.mxu0 }
  0xf9   : > { %v2823_v37 = vpop.f32.mrf.mxu1 }
  0xfa   : > { %v2825_v38 = vpop.f32.mrf.mxu0 }
  0xfb   : > { %v2827_v39 = vpop.f32.mrf.mxu1 }
  0xfc   : > { %v2829_v40 = vpop.f32.mrf.mxu0 }
  0xfd   : > { %v2831_v41 = vpop.f32.mrf.mxu1 }
  0xfe   : > { %v2833_v42 = vpop.f32.mrf.mxu0 }
  0xff   : > { %v2835_v43 = vpop.f32.mrf.mxu1 }
 0x100   : > { %v2837_v44 = vpop.f32.mrf.mxu0 }
 0x101   : > { %v2839_v45 = vpop.f32.mrf.mxu1 }
 0x102   : > { %v2841_v46 = vpop.f32.mrf.mxu0 }
 0x103   : > { %v2843_v47 = vpop.f32.mrf.mxu1 }
 0x104   : > { %v2845_v48 = vpop.f32.mrf.mxu0 }
 0x105   : > { %v2847_v49 = vpop.f32.mrf.mxu1 }
 0x106   : > { %v2849_v50 = vpop.f32.mrf.mxu0 }
 0x107   : > { %v2851_v51 = vpop.f32.mrf.mxu1 }
 0x108   : > { %v2853_v52 = vpop.f32.mrf.mxu0 }
 0x109   : > { %v2855_v53 = vpop.f32.mrf.mxu1 }
 0x10a   : > { %v2857_v54 = vpop.f32.mrf.mxu0 }
 0x10b   : > { %v2859_v55 = vpop.f32.mrf.mxu1 }
 0x10c   : > { %v2861_v56 = vpop.f32.mrf.mxu0 }
 0x10d   : > { %v2863_v57 = vpop.f32.mrf.mxu1 }
 0x10e   : > { %v2865_v58 = vpop.f32.mrf.mxu0 }
 0x10f   : > { %v2867_v59 = vpop.f32.mrf.mxu1 }
 0x110   : > { %v2869_v60 = vpop.f32.mrf.mxu0 }
 0x111   : > { %v2871_v61 = vpop.f32.mrf.mxu1 }
 0x112   : > { %v2873_v62 = vpop.f32.mrf.mxu0 }
 0x113   : > { %v2875_v63 = vpop.f32.mrf.mxu1 }
 0x114   : > { %v2877_v0 = vpop.f32.mrf.mxu0 }
 0x115   : > { %v2879_v1 = vpop.f32.mrf.mxu1 }
 0x116   : > { %v2881_v2 = vpop.f32.mrf.mxu0 }
 0x117   : > { %v2883_v3 = vpop.f32.mrf.mxu1 }
 0x118   : > { %v2885_v4 = vpop.f32.mrf.mxu0 }
 0x119   : > { %v2887_v5 = vpop.f32.mrf.mxu1 }
 0x11a   : > { %v2889_v6 = vpop.f32.mrf.mxu0 }
 0x11b   : > { %v2891_v7 = vpop.f32.mrf.mxu1 }
 0x11c   : > { %v2893_v8 = vpop.f32.mrf.mxu0 }
 0x11d   : > { %v2895_v9 = vpop.f32.mrf.mxu1 }
 0x11e   : > { %v2897_v10 = vpop.f32.mrf.mxu0 }
 0x11f   : > { %v2899_v11 = vpop.f32.mrf.mxu1 }
 0x120   : > { %v2901_v12 = vpop.f32.mrf.mxu0 }
 0x121   : > { %v2903_v13 = vpop.f32.mrf.mxu1 }
 0x122   : > { %v2905_v14 = vpop.f32.mrf.mxu0 }
 0x123   : > { %v2907_v15 = vpop.f32.mrf.mxu1 }
 0x124   : > { %v2909_v16 = vpop.f32.mrf.mxu0 }
 0x125   : > { %v2911_v17 = vpop.f32.mrf.mxu1 }
 0x126   : > { %v2913_v18 = vpop.f32.mrf.mxu0 }
 0x127   : > { %v2915_v19 = vpop.f32.mrf.mxu1 }
 0x128   : > { %3134 = vst [vmem:[#allocation5_spill] sm:$0xff] %v2915_v19  ;;  %v2917_v20 = vpop.f32.mrf.mxu0 }
 0x129   : > { %3135 = vst [vmem:[#allocation6_spill] sm:$0xff] %v2917_v20  ;;  %v2919_v21 = vpop.f32.mrf.mxu1 }
 0x12a   : > { %3136 = vst [vmem:[#allocation7_spill] sm:$0xff] %v2919_v21  ;;  %v2921_v22 = vpop.f32.mrf.mxu0 }
 0x12b   : > { %3137 = vst [vmem:[#allocation8_spill] sm:$0xff] %v2921_v22  ;;  %v2923_v23 = vpop.f32.mrf.mxu1  ;;  %v925_v22 = vadd.f32 %v2817_v33, %v538_v28  ;;  %v542_v33 = vadd.f32 %v2829_v40, %v2928_v24 }
 0x12c   : > { %3138 = vst [vmem:[#allocation9_spill] sm:$0xff] %v2923_v23  ;;  %v2930_v25 = vpop.f32.mrf.mxu0 }
 0x12d   : > { %3139 = vst [vmem:[#allocation10_spill] sm:$0xff] %v2930_v25  ;;  %v2932_v26 = vpop.f32.mrf.mxu1  ;;  %v929_v40 = vadd.f32 %v2831_v41, %v542_v33 }
 0x12e   : > { %3140 = vst [vmem:[#allocation11_spill] sm:$0xff] %v2932_v26  ;;  %v2934_v27 = vpop.f32.mrf.mxu0  ;;  %v539_v26 = vadd.f32 %v2821_v36, %v2928_v24 }
 0x12f   : > { %3141 = vst [vmem:[#allocation12_spill] sm:$0xff] %v2934_v27  ;;  %v2937_v29 = vpop.f32.mrf.mxu1 }
 0x130   : > { %3142 = vst [vmem:[#allocation13_spill] sm:$0xff] %v2937_v29  ;;  %v2939_v30 = vpop.f32.mrf.mxu0  ;;  %v923_v29 = vadd.f32 %v2819_v35, %v536_v31  ;;  %v540_v35 = vadd.f32 %v2928_v24, %v2833_v42 }
 0x131   : > { %3143 = vst [vmem:[#allocation14_spill] sm:$0xff] %v2939_v30  ;;  %v2943_v23 = vpop.f32.mrf.mxu1  ;;  %v537_v30 = vadd.f32 %v2928_v24, %v2825_v38 }
 0x132   : > { %3144 = vst [vmem:[#allocation15_spill] sm:$0xff] %v2943_v23  ;;  %v2945_v21 = vpop.f32.mrf.mxu0 }
 0x133   : > { %3145 = vst [vmem:[#allocation16_spill] sm:$0xff] %v2945_v21  ;;  %v2950_v25 = vpop.f32.mrf.mxu1  ;;  %v926_v21 = vadd.f32 %v2823_v37, %v539_v26  ;;  %v924_v20 = vadd.f32 %v2827_v39, %v537_v30  ;;  %v927_v30 = vadd.f32 %v2835_v43, %v540_v35 }
 0x134   : > { %3146 = vst [vmem:[#allocation17_spill] sm:$0xff] %v2950_v25  ;;  %v2303_v32 = vpop.f32.mrf.mxu0 }
 0x135   : > { %v1312_v34 = vadd.f32 %v2303_v32, %v925_v22  ;;  %v2351_v27 = vpop.f32.mrf.mxu1 }
 0x136   : > { %v1183_v23 = vpop.f32.mrf.mxu0 }
 0x137   : > { %v1699_v28 = vadd.f32 %v2351_v27, %v1312_v34  ;;  %v1310_v36 = vadd.f32 %v1183_v23, %v923_v29  ;;  %v1570_v19 = vpop.f32.mrf.mxu1  ;;  %v543_v23 = vadd.f32 %v2837_v44, %v2928_v24  ;;  %v546_v44 = vadd.f32 %v2845_v48, %v2928_v24 }
 0x138   : > { %v2304_v25 = vpop.f32.mrf.mxu0  ;;  %v547_v48 = vadd.f32 %v2853_v52, %v2928_v24  ;;  %v550_v52 = vadd.f32 %v2861_v56, %v2928_v24  ;;  %v551_v56 = vadd.f32 %v2869_v60, %v2928_v24  ;;  %v554_v60 = vadd.f32 %v2877_v0, %v2928_v24 }
 0x139   : > { %1731 = vst [vmem:[%s2963_s27 + $0x10] sm:$0xff] %v1699_v28  ;;  %v1697_v38 = vadd.f32 %v1570_v19, %v1310_v36  ;;  %v1313_v37 = vadd.f32 %v2304_v25, %v926_v21  ;;  %v2352_v22 = vpop.f32.mrf.mxu1  ;;  %v541_v19 = vadd.f32 %v2928_v24, %v2841_v46  ;;  %v930_v32 = vadd.f32 %v2839_v45, %v543_v23 }
 0x13a   : > { %v1186_v26 = vpop.f32.mrf.mxu0  ;;  %v544_v46 = vadd.f32 %v2928_v24, %v2849_v50  ;;  %v545_v50 = vadd.f32 %v2928_v24, %v2857_v54  ;;  %v548_v54 = vadd.f32 %v2928_v24, %v2865_v58  ;;  %v549_v58 = vadd.f32 %v2928_v24, %v2873_v62 }
 0x13b   : > { %1729 = vst [vmem:[%s2963_s27] sm:$0xff] %v1697_v38  ;;  %v1700_v39 = vadd.f32 %v2352_v22, %v1313_v37  ;;  %v1311_v27 = vadd.f32 %v1186_v26, %v924_v20  ;;  %v1573_v42 = vpop.f32.mrf.mxu1  ;;  %v928_v28 = vadd.f32 %v2843_v47, %v541_v19  ;;  %v933_v37 = vadd.f32 %v2847_v49, %v546_v44 }
 0x13c   : > { %v2307_v29 = vpop.f32.mrf.mxu0  ;;  %v931_v23 = vadd.f32 %v2851_v51, %v544_v46  ;;  %v937_v44 = vadd.f32 %v2863_v57, %v550_v52  ;;  %v552_v62 = vadd.f32 %v2928_v24, %v2881_v2  ;;  %v555_v0 = vadd.f32 %v2885_v4, %v2928_v24 }
 0x13d   : > { %1732 = vst [vmem:[%s2963_s27 + $0x18] sm:$0xff] %v1700_v39  ;;  %v1698_v21 = vadd.f32 %v1573_v42, %v1311_v27  ;;  %v1316_v25 = vadd.f32 %v2307_v29, %v929_v40  ;;  %v2355_v31 = vpop.f32.mrf.mxu1  ;;  %v934_v29 = vadd.f32 %v2855_v53, %v547_v48  ;;  %v936_v48 = vadd.f32 %v2875_v63, %v549_v58 }
 0x13e   : > { %v1199_v41 = vpop.f32.mrf.mxu0  ;;  %v553_v2 = vadd.f32 %v2928_v24, %v2889_v6  ;;  %v942_v52 = vadd.f32 %v2887_v5, %v555_v0  ;;  %v558_v4 = vadd.f32 %v2893_v8, %v2928_v24  ;;  %v556_v6 = vadd.f32 %v2928_v24, %v2897_v10 }
 0x13f   : > { %1730 = vst [vmem:[%s2963_s27 + $0x8] sm:$0xff] %v1698_v21  ;;  %v1703_v20 = vadd.f32 %v2355_v31, %v1316_v25  ;;  %v1314_v34 = vadd.f32 %v1199_v41, %v927_v30  ;;  %v1586_v33 = vpop.f32.mrf.mxu1  ;;  %v932_v25 = vadd.f32 %v2859_v55, %v545_v50  ;;  %v559_v8 = vadd.f32 %v2901_v12, %v2928_v24 }
 0x140   : > { %v2308_v43 = vpop.f32.mrf.mxu0  ;;  %v557_v10 = vadd.f32 %v2928_v24, %v2905_v14  ;;  %v562_v12 = vadd.f32 %v2909_v16, %v2928_v24  ;;  %v560_v14 = vadd.f32 %v2928_v24, %v2913_v18  ;;  %v3147_v16 = vld [vmem:[#allocation6_spill] sm:$0xff] }
 0x141   : > { %1735 = vst [vmem:[%s2963_s27 + $0x30] sm:$0xff] %v1703_v20  ;;  %v1701_v36 = vadd.f32 %v1586_v33, %v1314_v34  ;;  %v1317_v35 = vadd.f32 %v2308_v43, %v930_v32  ;;  %v2356_v38 = vpop.f32.mrf.mxu1  ;;  %v935_v43 = vadd.f32 %v2867_v59, %v548_v54 }
 0x142   : > { %v1202_v45 = vpop.f32.mrf.mxu0 }
 0x143   : > { %1733 = vst [vmem:[%s2963_s27 + $0x20] sm:$0xff] %v1701_v36  ;;  %v1704_v22 = vadd.f32 %v2356_v38, %v1317_v35  ;;  %v1315_v26 = vadd.f32 %v1202_v45, %v928_v28  ;;  %v1589_v40 = vpop.f32.mrf.mxu1  ;;  %v938_v35 = vadd.f32 %v2871_v61, %v551_v56  ;;  %v943_v56 = vadd.f32 %v2899_v11, %v556_v6 }
 0x144   : > { %v2311_v47 = vpop.f32.mrf.mxu0 }
 0x145   : > { %1736 = vst [vmem:[%s2963_s27 + $0x38] sm:$0xff] %v1704_v22  ;;  %v1702_v39 = vadd.f32 %v1589_v40, %v1315_v26  ;;  %v1320_v27 = vadd.f32 %v2311_v47, %v933_v37  ;;  %v2359_v42 = vpop.f32.mrf.mxu1  ;;  %v941_v47 = vadd.f32 %v2879_v1, %v554_v60  ;;  %v949_v60 = vadd.f32 %v2911_v17, %v562_v12 }
 0x146   : > { %v1215_v49 = vpop.f32.mrf.mxu0 }
 0x147   : > { %1734 = vst [vmem:[%s2963_s27 + $0x28] sm:$0xff] %v1702_v39  ;;  %v1707_v30 = vadd.f32 %v2359_v42, %v1320_v27  ;;  %v1318_v19 = vadd.f32 %v1215_v49, %v931_v23  ;;  %v1602_v21 = vpop.f32.mrf.mxu1  ;;  %v939_v27 = vadd.f32 %v2883_v3, %v552_v62 }
 0x148   : > { %v2312_v51 = vpop.f32.mrf.mxu0 }
 0x149   : > { %1739 = vst [vmem:[%s2963_s27 + $0x50] sm:$0xff] %v1707_v30  ;;  %v1705_v31 = vadd.f32 %v1602_v21, %v1318_v19  ;;  %v1321_v41 = vadd.f32 %v2312_v51, %v934_v29  ;;  %v2360_v32 = vpop.f32.mrf.mxu1  ;;  %v940_v51 = vadd.f32 %v2891_v7, %v553_v2 }
 0x14a   : > { %v1218_v53 = vpop.f32.mrf.mxu0 }
 0x14b   : > { %1737 = vst [vmem:[%s2963_s27 + $0x40] sm:$0xff] %v1705_v31  ;;  %v1708_v20 = vadd.f32 %v2360_v32, %v1321_v41  ;;  %v1319_v34 = vadd.f32 %v1218_v53, %v932_v25  ;;  %v1605_v33 = vpop.f32.mrf.mxu1  ;;  %v945_v41 = vadd.f32 %v2895_v9, %v558_v4 }
 0x14c   : > { %v2315_v55 = vpop.f32.mrf.mxu0 }
 0x14d   : > { %1740 = vst [vmem:[%s2963_s27 + $0x58] sm:$0xff] %v1708_v20  ;;  %v1706_v28 = vadd.f32 %v1605_v33, %v1319_v34  ;;  %v1324_v46 = vadd.f32 %v2315_v55, %v937_v44  ;;  %v2363_v36 = vpop.f32.mrf.mxu1  ;;  %v946_v55 = vadd.f32 %v2903_v13, %v559_v8 }
 0x14e   : > { %v1231_v57 = vpop.f32.mrf.mxu0 }
 0x14f   : > { %1738 = vst [vmem:[%s2963_s27 + $0x48] sm:$0xff] %v1706_v28  ;;  %v1711_v38 = vadd.f32 %v2363_v36, %v1324_v46  ;;  %v1322_v45 = vadd.f32 %v1231_v57, %v935_v43  ;;  %v1618_v37 = vpop.f32.mrf.mxu1  ;;  %v944_v46 = vadd.f32 %v2907_v15, %v557_v10 }
 0x150   : > { %v2316_v59 = vpop.f32.mrf.mxu0 }
 0x151   : > { %1743 = vst [vmem:[%s2963_s27 + $0x70] sm:$0xff] %v1711_v38  ;;  %v1709_v22 = vadd.f32 %v1618_v37, %v1322_v45  ;;  %v1325_v26 = vadd.f32 %v2316_v59, %v938_v35  ;;  %v2364_v40 = vpop.f32.mrf.mxu1  ;;  %v563_v38 = vadd.f32 %v3147_v16, %v2928_v24 }
 0x152   : > { %v1234_v61 = vpop.f32.mrf.mxu0 }
 0x153   : > { %1741 = vst [vmem:[%s2963_s27 + $0x60] sm:$0xff] %v1709_v22  ;;  %v1712_v23 = vadd.f32 %v2364_v40, %v1325_v26  ;;  %v1323_v50 = vadd.f32 %v1234_v61, %v936_v48  ;;  %v1621_v39 = vpop.f32.mrf.mxu1  ;;  %v3148_v48 = vld [vmem:[#allocation5_spill] sm:$0xff]  ;;  %v3149_v22 = vld [vmem:[#allocation8_spill] sm:$0xff] }
 0x154   : > { %v2319_v63 = vpop.f32.mrf.mxu0  ;;  %v947_v62 = vadd.f32 %v3148_v48, %v560_v14  ;;  %v561_v18 = vadd.f32 %v2928_v24, %v3149_v22 }
 0x155   : > { %1744 = vst [vmem:[%s2963_s27 + $0x78] sm:$0xff] %v1712_v23  ;;  %v1710_v42 = vadd.f32 %v1621_v39, %v1323_v50  ;;  %v1328_v49 = vadd.f32 %v2319_v63, %v941_v47  ;;  %v2367_v29 = vpop.f32.mrf.mxu1  ;;  %v3150_v47 = vld [vmem:[#allocation7_spill] sm:$0xff]  ;;  %v3151_v23 = vld [vmem:[#allocation10_spill] sm:$0xff] }
 0x156   : > { %v1247_v1 = vpop.f32.mrf.mxu0  ;;  %v950_v0 = vadd.f32 %v3150_v47, %v563_v38  ;;  %v566_v50 = vadd.f32 %v3151_v23, %v2928_v24 }
 0x157   : > { %1742 = vst [vmem:[%s2963_s27 + $0x68] sm:$0xff] %v1710_v42  ;;  %v1715_v30 = vadd.f32 %v2367_v29, %v1328_v49  ;;  %v1326_v19 = vadd.f32 %v1247_v1, %v939_v27  ;;  %v1634_v21 = vpop.f32.mrf.mxu1  ;;  %v3152_v42 = vld [vmem:[#allocation9_spill] sm:$0xff]  ;;  %v3153_v29 = vld [vmem:[#allocation12_spill] sm:$0xff] }
 0x158   : > { %v2320_v3 = vpop.f32.mrf.mxu0  ;;  %v948_v49 = vadd.f32 %v3152_v42, %v561_v18  ;;  %v564_v1 = vadd.f32 %v2928_v24, %v3153_v29 }
 0x159   : > { %1747 = vst [vmem:[%s2963_s27 + $0x90] sm:$0xff] %v1715_v30  ;;  %v1713_v25 = vadd.f32 %v1634_v21, %v1326_v19  ;;  %v1329_v54 = vadd.f32 %v2320_v3, %v942_v52  ;;  %v2368_v31 = vpop.f32.mrf.mxu1  ;;  %v3154_v21 = vld [vmem:[#allocation11_spill] sm:$0xff] }
 0x15a   : > { %v1250_v5 = vpop.f32.mrf.mxu0  ;;  %v953_v3 = vadd.f32 %v3154_v21, %v566_v50 }
 0x15b   : > { %1745 = vst [vmem:[%s2963_s27 + $0x80] sm:$0xff] %v1713_v25  ;;  %v1716_v32 = vadd.f32 %v2368_v31, %v1329_v54  ;;  %v1327_v53 = vadd.f32 %v1250_v5, %v940_v51  ;;  %v1637_v44 = vpop.f32.mrf.mxu1  ;;  %v3155_v51 = vld [vmem:[#allocation14_spill] sm:$0xff] }
 0x15c   : > { %v2323_v7 = vpop.f32.mrf.mxu0  ;;  %v567_v6 = vadd.f32 %v3155_v51, %v2928_v24 }
 0x15d   : > { %1748 = vst [vmem:[%s2963_s27 + $0x98] sm:$0xff] %v1716_v32  ;;  %v1714_v20 = vadd.f32 %v1637_v44, %v1327_v53  ;;  %v1332_v34 = vadd.f32 %v2323_v7, %v945_v41  ;;  %v2371_v33 = vpop.f32.mrf.mxu1  ;;  %v3156_v41 = vld [vmem:[#allocation13_spill] sm:$0xff]  ;;  %v3157_v32 = vld [vmem:[#allocation16_spill] sm:$0xff] }
 0x15e   : > { %v1263_v9 = vpop.f32.mrf.mxu0  ;;  %v951_v8 = vadd.f32 %v3156_v41, %v564_v1  ;;  %v565_v53 = vadd.f32 %v2928_v24, %v3157_v32 }
 0x15f   : > { %1746 = vst [vmem:[%s2963_s27 + $0x88] sm:$0xff] %v1714_v20  ;;  %v1719_v43 = vadd.f32 %v2371_v33, %v1332_v34  ;;  %v1330_v58 = vadd.f32 %v1263_v9, %v943_v56  ;;  %v1650_v28 = vpop.f32.mrf.mxu1  ;;  %v3158_v20 = vld [vmem:[#allocation15_spill] sm:$0xff] }
 0x160   : > { %v2324_v11 = vpop.f32.mrf.mxu0  ;;  %v954_v34 = vadd.f32 %v3158_v20, %v567_v6 }
 0x161   : > { %1751 = vst [vmem:[%s2963_s27 + $0xb0] sm:$0xff] %v1719_v43  ;;  %v1717_v36 = vadd.f32 %v1650_v28, %v1330_v58  ;;  %v1333_v57 = vadd.f32 %v2324_v11, %v946_v55  ;;  %v2372_v35 = vpop.f32.mrf.mxu1  ;;  %v3159_v43 = vld [vmem:[#allocation17_spill] sm:$0xff] }
 0x162   : > { %v1266_v13 = vpop.f32.mrf.mxu0  ;;  %v952_v58 = vadd.f32 %v3159_v43, %v565_v53 }
 0x163   : > { %1749 = vst [vmem:[%s2963_s27 + $0xa0] sm:$0xff] %v1717_v36  ;;  %v1720_v45 = vadd.f32 %v2372_v35, %v1333_v57  ;;  %v1331_v37 = vadd.f32 %v1266_v13, %v944_v46  ;;  %v1653_v59 = vpop.f32.mrf.mxu1 }
 0x164   : > { %v2327_v15 = vpop.f32.mrf.mxu0 }
 0x165   : > { %1752 = vst [vmem:[%s2963_s27 + $0xb8] sm:$0xff] %v1720_v45  ;;  %v1718_v26 = vadd.f32 %v1653_v59, %v1331_v37  ;;  %v1336_v40 = vadd.f32 %v2327_v15, %v949_v60  ;;  %v2375_v61 = vpop.f32.mrf.mxu1 }
 0x166   : > { %v1279_v17 = vpop.f32.mrf.mxu0 }
 0x167   : > { %1750 = vst [vmem:[%s2963_s27 + $0xa8] sm:$0xff] %v1718_v26  ;;  %v1723_v39 = vadd.f32 %v2375_v61, %v1336_v40  ;;  %v1334_v63 = vadd.f32 %v1279_v17, %v947_v62  ;;  %v1666_v27 = vpop.f32.mrf.mxu1 }
 0x168   : > { %v2328_v2 = vpop.f32.mrf.mxu0 }
 0x169   : > { %1755 = vst [vmem:[%s2963_s27 + $0xd0] sm:$0xff] %v1723_v39  ;;  %v1721_v52 = vadd.f32 %v1666_v27, %v1334_v63  ;;  %v1337_v4 = vadd.f32 %v2328_v2, %v950_v0  ;;  %v2376_v30 = vpop.f32.mrf.mxu1 }
 0x16a   : > { %v1282_v19 = vpop.f32.mrf.mxu0 }
 0x16b   : > { %1753 = vst [vmem:[%s2963_s27 + $0xc0] sm:$0xff] %v1721_v52  ;;  %v1724_v25 = vadd.f32 %v2376_v30, %v1337_v4  ;;  %v1335_v54 = vadd.f32 %v1282_v19, %v948_v49  ;;  %v1669_v31 = vpop.f32.mrf.mxu1 }
 0x16c   : > { %v2331_v5 = vpop.f32.mrf.mxu0 }
 0x16d   : > { %1756 = vst [vmem:[%s2963_s27 + $0xd8] sm:$0xff] %v1724_v25  ;;  %v1722_v44 = vadd.f32 %v1669_v31, %v1335_v54  ;;  %v1340_v7 = vadd.f32 %v2331_v5, %v953_v3  ;;  %v2379_v56 = vpop.f32.mrf.mxu1 }
 0x16e   : > { %v1295_v10 = vpop.f32.mrf.mxu0 }
 0x16f   : > { %1754 = vst [vmem:[%s2963_s27 + $0xc8] sm:$0xff] %v1722_v44  ;;  %v1727_v33 = vadd.f32 %v2379_v56, %v1340_v7  ;;  %v1338_v9 = vadd.f32 %v1295_v10, %v951_v8  ;;  %v1682_v55 = vpop.f32.mrf.mxu1 }
 0x170   : > { %v2332_v12 = vpop.f32.mrf.mxu0 }
 0x171   : > { %1759 = vst [vmem:[%s2963_s27 + $0xf0] sm:$0xff] %v1727_v33  ;;  %v1725_v24 = vadd.f32 %v1682_v55, %v1338_v9  ;;  %v1341_v28 = vadd.f32 %v2332_v12, %v954_v34  ;;  %v2380_v11 = vpop.f32.mrf.mxu1 }
 0x172   : > { %v1298_v46 = vpop.f32.mrf.mxu0 }
 0x173   : > { %1757 = vst [vmem:[%s2963_s27 + $0xe0] sm:$0xff] %v1725_v24  ;;  %v1728_v14 = vadd.f32 %v2380_v11, %v1341_v28  ;;  %v1339_v36 = vadd.f32 %v1298_v46, %v952_v58  ;;  %v1685_v57 = vpop.f32.mrf.mxu1 }
 0x175   : > { %1760 = vst [vmem:[%s2963_s27 + $0xf8] sm:$0xff] %v1728_v14  ;;  %v1726_v35 = vadd.f32 %v1685_v57, %v1339_v36 }
 0x177   : > { %1758 = vst [vmem:[%s2963_s27 + $0xe8] sm:$0xff] %v1726_v35 }
 0x178   : > { %2531 = shalt.err (!%p2528_p3)
}
 0x179   : > { %s2532_s10 = scalar_lea.hbm %s3080_s6, 4096  ;;  %s2536_s19 = scalar_lea.hbm %s3131_s3, 8192 }
 0x17a   : > { %p2533_p4 = scmp.ne.s32.totalorder %s3080_s6, %s2532_s10  ;;  %p2537_p9 = scmp.lt.s32.totalorder %s3080_s6, %s3131_s3 }
 0x17b   : > { %p2538_p10 = scmp.lt.s32.totalorder %s2536_s19, %s2532_s10 }
 0x17c   : > { %p2534_p7 = pnand %p2533_p4, %p2641_p5 }
 0x17d   : > { %p2539_p11 = por %p2538_p10, %p2537_p9 }
 0x17e   : > { %p2535_p8 = pneg %p2534_p7 }
 0x180   : > { %p2540_p12 = pnand %p2539_p11, %p2535_p8 }
 0x182   : > { %2543 = shalt.err (!%p2540_p12)
}
 0x183   : > { %s2581_s24 = smov 128   ;;  %s2582_s25 = smov 8  }
 0x184   : > { %2381 = dma.vmem_to_hbm [thread:$0]  (%p2641_p5), %s3082_s29, 4096, %s3080_s6, %s3088_s16, %s2581_s24, %s2581_s24, %s2582_s25  }
 0x185 PF: > { %p2387_p13 = scmp.ge.s32.totalorder %s2578_s15, 2  ;;  %s1790_s27 = sand.u32 1, %s2566_s12  }
 0x186   : > { %s1791_s28 = scalar_lea.sflag [#allocation3], %s1790_s27 }
 0x187   : > { %p2384_p0 = pnand %p2387_p13, %p2645_p6 }
 0x189   : > { %p2385_p1 = pneg %p2384_p0 }
 0x18b   : > { %2561 = dma.done.wait (%p2385_p1), %s1791_s28, 4096  }
 0x18c   : > { %2563 = vsyncadd (%p2385_p1), %s1791_s28, 4294963200  ;;  %p13_p2 = scmp.ge.s32.totalorder %s2628_s18, 4   ;;  %s3160_s12 = smov %s2570_s13 }
 0x18d   : > { %s3161_s13 = smov %s2574_s14  ;;  %s3162_s14 = smov %s2639_s21 }
 0x18e   : > { %s3163_s15 = smov %s2628_s18  ;;  %15 = sbr.rel (!%p13_p2) target bundleno = 3 (0x3), region = 73 }
 0x193   :  { %1796 = vsyncpa [#allocation3], 1 }
 0x194   :  { %1798 = vsyncpa [#allocation3 + $0x1], 1 }

</bundles_post_ra>
